<compile_context>
chip_gen: v6e
topology: v6e:2x2x1
jax: 0.10.0
libtpu: 0.0.40
codegen_flags: <defaults>
</compile_context>

<pallas_src>
import functools

import jax
import jax.numpy as jnp
from jax.experimental import pallas as pl
from jax.experimental.pallas import tpu as pltpu


def _round_up(v, m):
    return ((v + m - 1) // m) * m


def _gcn_encoder_kernel(a_ref, x_ref, w1_ref, b1_ref, w2_ref, b2_ref, pool_ref,
                        z_ref, g_ref):
    # ---- fused Â normalization (VPU/XLU work, hidden under MXU pushes) ------
    a = a_ref[...]                                                # [NP, NP] f32 (0/1 + I)
    d_row = jax.lax.rsqrt(jnp.maximum(jnp.sum(a, axis=1, keepdims=True), 1e-12))  # [NP, 1]
    d_col = jax.lax.rsqrt(jnp.maximum(jnp.sum(a, axis=0, keepdims=True), 1e-12))  # [1, NP]
    adj = (d_row * a * d_col).astype(jnp.bfloat16)                # Â, bf16 for MXU

    x = x_ref[...]                                                # [NP, FP] bf16
    fp, hp = w1_ref.shape

    # ---- layer 1: relu(Â x W1 + b1), narrower operand multiplied by Â -------
    if fp > hp:
        xw = jnp.dot(x, w1_ref[...], preferred_element_type=jnp.float32)          # [NP, HP]
        h = jnp.dot(adj, xw.astype(jnp.bfloat16), preferred_element_type=jnp.float32)
    else:
        ax = jnp.dot(adj, x, preferred_element_type=jnp.float32)                  # [NP, FP]
        h = jnp.dot(ax.astype(jnp.bfloat16), w1_ref[...], preferred_element_type=jnp.float32)
    h = jnp.maximum(h + b1_ref[...], 0.0)                         # f32 bias + relu (VPU)

    # ---- layer 2: Â h W2 + b2 ------------------------------------------------
    ah = jnp.dot(adj, h.astype(jnp.bfloat16), preferred_element_type=jnp.float32)  # [NP, HP]
    z = jnp.dot(ah.astype(jnp.bfloat16), w2_ref[...],
                preferred_element_type=jnp.float32) + b2_ref[...]
    z_ref[...] = z                                                # node embeddings (f32)

    # ---- global mean pool: g = P z ------------------------------------------
    g_ref[...] = jnp.dot(pool_ref[...], z.astype(jnp.bfloat16),
                         preferred_element_type=jnp.float32)


@functools.partial(jax.jit, static_argnames=("num_graphs",))
def encoder_forward(x, edge_index, batch, params, num_graphs):
    """Pallas-backed forward:  (z, g) = encoder(x, edge_index, batch)."""
    N, F = x.shape
    H = params["w1"].shape[1]
    G = num_graphs

    # padded (lane-dense) shapes
    NP = max(_round_up(N, 128), 128)
    FP = max(_round_up(F, 128), 128)
    HP = max(_round_up(H, 128), 128)
    GP = max(_round_up(G, 8), 8)

    # ---- glue (plain JAX): sparse edge list -> dense 0/1 adjacency -----------
    src, dst = edge_index[0], edge_index[1]
    A = jnp.zeros((NP, NP), jnp.float32).at[src, dst].set(1.0)   # dedups duplicate edges
    A = jnp.maximum(A, A.T)                                      # symmetrize (undirected)
    A = A * (1.0 - jnp.eye(NP, dtype=jnp.float32))               # drop any existing self loops
    diag = (jnp.arange(NP) < N).astype(jnp.float32)
    A = A + jnp.diag(diag)                                       # unit self loops, real nodes only

    # mean-pool membership matrix [GP, NP] (padded nodes / graphs -> zero rows/cols)
    batch_p = jnp.full((NP,), -1, dtype=batch.dtype).at[:N].set(batch)
    onehot = (batch_p[None, :] ==
              jnp.arange(GP, dtype=batch.dtype)[:, None]).astype(jnp.float32)
    counts = jnp.maximum(onehot.sum(axis=1, keepdims=True), 1.0)
    pool = (onehot / counts).astype(jnp.bfloat16)

    # lane-padded, bf16 kernel inputs (f32 biases)
    x_p = jnp.zeros((NP, FP), jnp.float32).at[:N, :F].set(x).astype(jnp.bfloat16)
    w1_p = jnp.zeros((FP, HP), jnp.float32).at[:F, :H].set(params["w1"]).astype(jnp.bfloat16)
    w2_p = jnp.zeros((HP, HP), jnp.float32).at[:H, :H].set(params["w2"]).astype(jnp.bfloat16)
    b1_p = jnp.zeros((1, HP), jnp.float32).at[0, :H].set(params["b1"])
    b2_p = jnp.zeros((1, HP), jnp.float32).at[0, :H].set(params["b2"])

    # ---- hot path: single Pallas kernel, everything resident in VMEM ---------
    full = lambda shape: pl.BlockSpec(shape, lambda: tuple(0 for _ in shape))
    z_p, g_p = pl.pallas_call(
        _gcn_encoder_kernel,
        out_shape=(
            jax.ShapeDtypeStruct((NP, HP), jnp.float32),
            jax.ShapeDtypeStruct((GP, HP), jnp.float32),
        ),
        in_specs=[
            full((NP, NP)),      # A (raw, normalized in-kernel)
            full((NP, FP)),      # x
            full((FP, HP)),      # w1
            full((1, HP)),       # b1
            full((HP, HP)),      # w2
            full((1, HP)),       # b2
            full((GP, NP)),      # pool
        ],
        out_specs=(
            full((NP, HP)),      # z
            full((GP, HP)),      # g
        ),
        compiler_params=pltpu.CompilerParams(vmem_limit_bytes=32 << 20),
    )(A, x_p, w1_p, b1_p, w2_p, b2_p, pool)

    return z_p[:N, :H], g_p[:G, :H]


def _reference_forward(x, edge_index, batch, params, num_graphs):
    """Pure-JAX f32 reference of the same GCN encoder (for validation)."""
    N = x.shape[0]
    src, dst = edge_index[0], edge_index[1]
    A = jnp.zeros((N, N), jnp.float32).at[src, dst].set(1.0)
    A = jnp.maximum(A, A.T)
    A = A * (1.0 - jnp.eye(N)) + jnp.eye(N)
    d = jax.lax.rsqrt(jnp.maximum(A.sum(1), 1e-12))
    adj = d[:, None] * A * d[None, :]
    h = jnp.maximum(adj @ x @ params["w1"] + params["b1"], 0.0)
    z = adj @ h @ params["w2"] + params["b2"]
    onehot = (batch[None, :] == jnp.arange(num_graphs)[:, None]).astype(jnp.float32)
    pool = onehot / jnp.maximum(onehot.sum(1, keepdims=True), 1.0)
    return z, pool @ z


def init_params(key, in_dim, hidden):
    k1, k2 = jax.random.split(key)
    return {
        "w1": jax.random.normal(k1, (in_dim, hidden), jnp.float32) / jnp.sqrt(jnp.float32(in_dim)),
        "b1": jnp.zeros((hidden,), jnp.float32),
        "w2": jax.random.normal(k2, (hidden, hidden), jnp.float32) / jnp.sqrt(jnp.float32(hidden)),
        "b2": jnp.zeros((hidden,), jnp.float32),
    }


if __name__ == "__main__":
    key = jax.random.PRNGKey(0)
    k_x, k_e, k_p = jax.random.split(key, 3)

    N, F, H, E, G = 32, 16, 32, 64, 4   # nodes, in-features, hidden, edges, graphs

    x = jax.random.normal(k_x, (N, F), jnp.float32)
    edge_index = jax.random.randint(k_e, (2, E), 0, N, dtype=jnp.int32)
    batch = jnp.repeat(jnp.arange(G, dtype=jnp.int32), N // G)   # 8 nodes / graph

    params = init_params(k_p, F, H)

    z, g = encoder_forward(x, edge_index, batch, params, num_graphs=G)
    jax.block_until_ready((z, g))

    assert z.shape == (N, H) and g.shape == (G, H)
    assert jnp.all(jnp.isfinite(z)) and jnp.all(jnp.isfinite(g))

    z_ref, g_ref = _reference_forward(x, edge_index, batch, params, G)
    assert jnp.allclose(z, z_ref, rtol=0.1, atol=0.1), "z mismatch vs reference"
    assert jnp.allclose(g, g_ref, rtol=0.1, atol=0.1), "g mismatch vs reference"

    print("KERNEL_OK")
</pallas_src>

<mosaic_0001>
module attributes {stable_mosaic.version = 11 : i64} {
  func.func @_gcn_encoder_kernel(%arg0: memref<128x128xf32, #tpu.memory_space<vmem>>, %arg1: memref<128x128xbf16, #tpu.memory_space<vmem>>, %arg2: memref<128x128xbf16, #tpu.memory_space<vmem>>, %arg3: memref<1x128xf32, #tpu.memory_space<vmem>>, %arg4: memref<128x128xbf16, #tpu.memory_space<vmem>>, %arg5: memref<1x128xf32, #tpu.memory_space<vmem>>, %arg6: memref<8x128xbf16, #tpu.memory_space<vmem>>, %arg7: memref<128x128xf32, #tpu.memory_space<vmem>>, %arg8: memref<8x128xf32, #tpu.memory_space<vmem>>) attributes {dimension_semantics = [], scalar_prefetch = 0 : i64, scratch_operands = 0 : i64, tpu.core_type = #tpu.core_type<tc>} {
    %c0 = arith.constant 0 : index
    %c0_0 = arith.constant 0 : index
    %0 = vector.load %arg0[%c0, %c0_0] : memref<128x128xf32, #tpu.memory_space<vmem>>, vector<128x128xf32>
    %cst = arith.constant dense<0.000000e+00> : vector<128xf32>
    %1 = vector.multi_reduction <add>, %0, %cst [1] : vector<128x128xf32> to vector<128xf32>
    %2 = vector.shape_cast %1 : vector<128xf32> to vector<128x1xf32>
    %cst_1 = arith.constant 9.99999996E-13 : f32
    %3 = vector.broadcast %cst_1 : f32 to vector<128x1xf32>
    %4 = arith.maximumf %2, %3 : vector<128x1xf32>
    %5 = math.rsqrt %4 : vector<128x1xf32>
    %cst_2 = arith.constant dense<0.000000e+00> : vector<128xf32>
    %6 = vector.multi_reduction <add>, %0, %cst_2 [0] : vector<128x128xf32> to vector<128xf32>
    %7 = vector.shape_cast %6 : vector<128xf32> to vector<1x128xf32>
    %cst_3 = arith.constant 9.99999996E-13 : f32
    %8 = vector.broadcast %cst_3 : f32 to vector<1x128xf32>
    %9 = arith.maximumf %7, %8 : vector<1x128xf32>
    %10 = math.rsqrt %9 : vector<1x128xf32>
    %11 = vector.broadcast %5 : vector<128x1xf32> to vector<128x128xf32>
    %12 = arith.mulf %11, %0 : vector<128x128xf32>
    %13 = vector.broadcast %10 : vector<1x128xf32> to vector<128x128xf32>
    %14 = arith.mulf %12, %13 : vector<128x128xf32>
    %15 = arith.truncf %14 : vector<128x128xf32> to vector<128x128xbf16>
    %c0_4 = arith.constant 0 : index
    %c0_5 = arith.constant 0 : index
    %16 = vector.load %arg1[%c0_4, %c0_5] : memref<128x128xbf16, #tpu.memory_space<vmem>>, vector<128x128xbf16>
    %cst_6 = arith.constant dense<0.000000e+00> : vector<128x128xf32>
    %17 = tpu.matmul %15, %16, %cst_6 {dimension_numbers = #tpu.dot_dimension_numbers<[1], [0], [0], [1], [0, 0, 1, 1], [], []>} : vector<128x128xbf16>, vector<128x128xbf16>, vector<128x128xf32> -> vector<128x128xf32>
    %18 = arith.truncf %17 : vector<128x128xf32> to vector<128x128xbf16>
    %c0_7 = arith.constant 0 : index
    %c0_8 = arith.constant 0 : index
    %19 = vector.load %arg2[%c0_7, %c0_8] : memref<128x128xbf16, #tpu.memory_space<vmem>>, vector<128x128xbf16>
    %cst_9 = arith.constant dense<0.000000e+00> : vector<128x128xf32>
    %20 = tpu.matmul %18, %19, %cst_9 {dimension_numbers = #tpu.dot_dimension_numbers<[1], [0], [0], [1], [0, 0, 1, 1], [], []>} : vector<128x128xbf16>, vector<128x128xbf16>, vector<128x128xf32> -> vector<128x128xf32>
    %c0_10 = arith.constant 0 : index
    %c0_11 = arith.constant 0 : index
    %21 = vector.load %arg3[%c0_10, %c0_11] : memref<1x128xf32, #tpu.memory_space<vmem>>, vector<1x128xf32>
    %22 = vector.broadcast %21 : vector<1x128xf32> to vector<128x128xf32>
    %23 = arith.addf %20, %22 : vector<128x128xf32>
    %cst_12 = arith.constant 0.000000e+00 : f32
    %24 = vector.broadcast %cst_12 : f32 to vector<128x128xf32>
    %25 = arith.maximumf %23, %24 : vector<128x128xf32>
    %26 = arith.truncf %25 : vector<128x128xf32> to vector<128x128xbf16>
    %cst_13 = arith.constant dense<0.000000e+00> : vector<128x128xf32>
    %27 = tpu.matmul %15, %26, %cst_13 {dimension_numbers = #tpu.dot_dimension_numbers<[1], [0], [0], [1], [0, 0, 1, 1], [], []>} : vector<128x128xbf16>, vector<128x128xbf16>, vector<128x128xf32> -> vector<128x128xf32>
    %28 = arith.truncf %27 : vector<128x128xf32> to vector<128x128xbf16>
    %c0_14 = arith.constant 0 : index
    %c0_15 = arith.constant 0 : index
    %29 = vector.load %arg4[%c0_14, %c0_15] : memref<128x128xbf16, #tpu.memory_space<vmem>>, vector<128x128xbf16>
    %cst_16 = arith.constant dense<0.000000e+00> : vector<128x128xf32>
    %30 = tpu.matmul %28, %29, %cst_16 {dimension_numbers = #tpu.dot_dimension_numbers<[1], [0], [0], [1], [0, 0, 1, 1], [], []>} : vector<128x128xbf16>, vector<128x128xbf16>, vector<128x128xf32> -> vector<128x128xf32>
    %c0_17 = arith.constant 0 : index
    %c0_18 = arith.constant 0 : index
    %31 = vector.load %arg5[%c0_17, %c0_18] : memref<1x128xf32, #tpu.memory_space<vmem>>, vector<1x128xf32>
    %32 = vector.broadcast %31 : vector<1x128xf32> to vector<128x128xf32>
    %33 = arith.addf %30, %32 : vector<128x128xf32>
    %c0_19 = arith.constant 0 : index
    %c0_20 = arith.constant 0 : index
    %34 = vector.load %arg7[%c0_19, %c0_20] : memref<128x128xf32, #tpu.memory_space<vmem>>, vector<128x128xf32>
    tpu.vector_store %arg7[%c0_19, %c0_20], %33 {strides = array<i32>} : memref<128x128xf32, #tpu.memory_space<vmem>>, vector<128x128xf32>,
    %c0_21 = arith.constant 0 : index
    %c0_22 = arith.constant 0 : index
    %35 = vector.load %arg6[%c0_21, %c0_22] : memref<8x128xbf16, #tpu.memory_space<vmem>>, vector<8x128xbf16>
    %36 = arith.truncf %33 : vector<128x128xf32> to vector<128x128xbf16>
    %cst_23 = arith.constant dense<0.000000e+00> : vector<8x128xf32>
    %37 = tpu.matmul %35, %36, %cst_23 {dimension_numbers = #tpu.dot_dimension_numbers<[1], [0], [0], [1], [0, 0, 1, 1], [], []>} : vector<8x128xbf16>, vector<128x128xbf16>, vector<8x128xf32> -> vector<8x128xf32>
    %c0_24 = arith.constant 0 : index
    %c0_25 = arith.constant 0 : index
    %38 = vector.load %arg8[%c0_24, %c0_25] : memref<8x128xf32, #tpu.memory_space<vmem>>, vector<8x128xf32>
    tpu.vector_store %arg8[%c0_24, %c0_25], %37 {strides = array<i32>} : memref<8x128xf32, #tpu.memory_space<vmem>>, vector<8x128xf32>,
    return
  }
}

</mosaic_0001>

<bundles_post_ra>
// kernel: encoder_forward.1
= control target key start
LH: loop header
LB: loop body
LE: loop exit
PB: predicated region body
PF: predicated region fallthrough
CT: control target
= control target key end

     0   :  { %vm1188_vm0 = vmmov 0   ;;  %s1557_s0 = inlined_call_operand.vmem [shape: f32[128,128], index: 0, kind: input, shape index: {}]   ;;  %s1558_s1 = inlined_call_operand.vmem [shape: bf16[128,128], index: 1, kind: input, shape index: {}]   ;;  %s1559_s2 = inlined_call_operand.vmem [shape: bf16[128,128], index: 2, kind: input, shape index: {}]   ;;  %s1560_s4 = inlined_call_operand.vmem [shape: bf16[128,128], index: 4, kind: input, shape index: {}]   ;;  %s1561_s3 = inlined_call_operand.vmem [shape: f32[1,128], index: 3, kind: input, shape index: {}]   ;;  %s1562_s5 = inlined_call_operand.vmem [shape: f32[1,128], index: 5, kind: input, shape index: {}]   ;;  %s1563_s7 = inlined_call_operand.vmem [shape: f32[128,128], index: 7, kind: output, shape index: {0}]   ;;  %s1564_s6 = inlined_call_operand.vmem [shape: bf16[8,128], index: 6, kind: input, shape index: {}]   ;;  %s1565_s8 = inlined_call_operand.vmem [shape: f32[8,128], index: 8, kind: output, shape index: {1}]  }
   0x1   :  { %v1237_v0 = vld [vmem:[%s1557_s0 + $0x10] sm:$0xff]  ;;  %v1242_v1 = vld [vmem:[%s1557_s0] sm:$0xff]  ;;  %v1249_v2 = vld [vmem:[%s1557_s0 + $0x18] sm:$0xff] }
   0x2   :  { %49 = vadd.xlane.f32.xlu1 %v1237_v0  ;;  %45 = vadd.xlane.f32.xlu0 %v1242_v1  ;;  %v1254_v3 = vld [vmem:[%s1557_s0 + $0x8] sm:$0xff]  ;;  %v1266_v5 = vld [vmem:[%s1557_s0 + $0x20] sm:$0xff]  ;;  %v1129_v6 = vld [vmem:[%s1558_s1 + $0x38] sm:$0xff]  }
   0x3   :  { %v1259_v4 = vld [vmem:[%s1557_s0 + $0x28] sm:$0xff]  ;;  %v1130_v7 = vld [vmem:[%s1558_s1 + $0x30] sm:$0xff]   ;;  %v1277_v8 = vld [vmem:[%s1557_s0 + $0x38] sm:$0xff]  ;;  %979 = vmatprep.subr.bf16.mxu0 %v1129_v6  ;;  %v109_v24 = vadd.f32 %v1254_v3, %v1242_v1 }
   0x4   :  { %v1282_v9 = vld [vmem:[%s1557_s0 + $0x30] sm:$0xff]  ;;  %980 = vmatpush3.bf16.msra.mxu0 %v1129_v6  ;;  %v1131_v10 = vld [vmem:[%s1558_s1 + $0x28] sm:$0xff]   ;;  %v1299_v12 = vld [vmem:[%s1557_s0 + $0x40] sm:$0xff] }
   0x5   :  { %981 = vmatprep.subr.bf16.mxu0 %v1130_v7  ;;  %v1294_v11 = vld [vmem:[%s1557_s0 + $0x48] sm:$0xff]  ;;  %v1132_v13 = vld [vmem:[%s1558_s1 + $0x20] sm:$0xff]   ;;  %v1309_v14 = vld [vmem:[%s1557_s0 + $0x58] sm:$0xff]  ;;  %v110_v25 = vadd.f32 %v109_v24, %v1237_v0 }
   0x6   :  { %51 = vadd.xlane.f32.xlu1 %v1249_v2  ;;  %47 = vadd.xlane.f32.xlu0 %v1254_v3  ;;  %v1314_v15 = vld [vmem:[%s1557_s0 + $0x50] sm:$0xff]  ;;  %v1133_v16 = vld [vmem:[%s1558_s1 + $0x18] sm:$0xff]   ;;  %v1324_v17 = vld [vmem:[%s1557_s0 + $0x68] sm:$0xff] }
   0x7   :  { %v1329_v18 = vld [vmem:[%s1557_s0 + $0x60] sm:$0xff]  ;;  %v1134_v19 = vld [vmem:[%s1558_s1 + $0x10] sm:$0xff]   ;;  %v1339_v20 = vld [vmem:[%s1557_s0 + $0x78] sm:$0xff]  ;;  %v111_v26 = vadd.f32 %v110_v25, %v1249_v2 }
   0x8   :  { %982 = vmatpush3.bf16.msra.mxu0 %v1130_v7  ;;  %v1344_v21 = vld [vmem:[%s1557_s0 + $0x70] sm:$0xff]  ;;  %v1135_v22 = vld [vmem:[%s1558_s1 + $0x8] sm:$0xff]   ;;  %v1136_v23 = vld [vmem:[%s1558_s1] sm:$0xff]  }
   0x9   :  { %983 = vmatprep.subr.bf16.mxu0 %v1131_v10  ;;  %v1137_v27 = vld [vmem:[%s1559_s2 + $0x38] sm:$0xff]   ;;  %v1138_v28 = vld [vmem:[%s1559_s2 + $0x30] sm:$0xff]   ;;  %v112_v29 = vadd.f32 %v111_v26, %v1266_v5  ;;  %v1139_v30 = vld [vmem:[%s1559_s2 + $0x28] sm:$0xff]  }
   0xa   :  { %55 = vadd.xlane.f32.xlu1 %v1259_v4  ;;  %53 = vadd.xlane.f32.xlu0 %v1266_v5  ;;  %v1140_v32 = vld [vmem:[%s1559_s2 + $0x20] sm:$0xff]   ;;  %v1141_v34 = vld [vmem:[%s1559_s2 + $0x18] sm:$0xff]   ;;  %v1142_v36 = vld [vmem:[%s1559_s2 + $0x10] sm:$0xff]  }
   0xb   :  { %1011 = vmatprep.subr.bf16.mxu1 %v1137_v27  ;;  %v113_v31 = vadd.f32 %v112_v29, %v1259_v4 }
   0xc   :  { %984 = vmatpush3.bf16.msra.mxu0 %v1131_v10  ;;  %1012 = vmatpush3.bf16.msra.mxu1 %v1137_v27 }
   0xd   :  { %985 = vmatprep.subr.bf16.mxu0 %v1132_v13  ;;  %1013 = vmatprep.subr.bf16.mxu1 %v1138_v28  ;;  %v114_v33 = vadd.f32 %v113_v31, %v1282_v9 }
   0xe   :  { %59 = vadd.xlane.f32.xlu1 %v1277_v8  ;;  %57 = vadd.xlane.f32.xlu0 %v1282_v9 }
   0xf   :  { %v115_v35 = vadd.f32 %v114_v33, %v1277_v8 }
  0x10   :  { %986 = vmatpush3.bf16.msra.mxu0 %v1132_v13  ;;  %1014 = vmatpush3.bf16.msra.mxu1 %v1138_v28 }
  0x11   :  { %987 = vmatprep.subr.bf16.mxu0 %v1133_v16  ;;  %1015 = vmatprep.subr.bf16.mxu1 %v1139_v30  ;;  %v116_v37 = vadd.f32 %v115_v35, %v1299_v12 }
  0x12   :  { %63 = vadd.xlane.f32.xlu1 %v1294_v11  ;;  %61 = vadd.xlane.f32.xlu0 %v1299_v12 }
  0x13   :  { %v117_v38 = vadd.f32 %v116_v37, %v1294_v11 }
  0x14   :  { %988 = vmatpush3.bf16.msra.mxu0 %v1133_v16  ;;  %1016 = vmatpush3.bf16.msra.mxu1 %v1139_v30 }
  0x15   :  { %989 = vmatprep.subr.bf16.mxu0 %v1134_v19  ;;  %1017 = vmatprep.subr.bf16.mxu1 %v1140_v32  ;;  %v118_v39 = vadd.f32 %v117_v38, %v1314_v15 }
  0x16   :  { %67 = vadd.xlane.f32.xlu1 %v1309_v14  ;;  %65 = vadd.xlane.f32.xlu0 %v1314_v15 }
  0x17   :  { %v119_v40 = vadd.f32 %v118_v39, %v1309_v14 }
  0x18   :  { %990 = vmatpush3.bf16.msra.mxu0 %v1134_v19  ;;  %1018 = vmatpush3.bf16.msra.mxu1 %v1140_v32 }
  0x19   :  { %991 = vmatprep.subr.bf16.mxu0 %v1135_v22  ;;  %1019 = vmatprep.subr.bf16.mxu1 %v1141_v34  ;;  %v120_v41 = vadd.f32 %v119_v40, %v1329_v18 }
  0x1a   :  { %71 = vadd.xlane.f32.xlu1 %v1324_v17  ;;  %69 = vadd.xlane.f32.xlu0 %v1329_v18 }
  0x1b   :  { %v121_v42 = vadd.f32 %v120_v41, %v1324_v17 }
  0x1c   :  { %992 = vmatpush3.bf16.msra.mxu0 %v1135_v22  ;;  %1020 = vmatpush3.bf16.msra.mxu1 %v1141_v34 }
  0x1d   :  { %993 = vmatprep.subr.bf16.mxu0 %v1136_v23  ;;  %1021 = vmatprep.subr.bf16.mxu1 %v1142_v36  ;;  %v122_v43 = vadd.f32 %v121_v42, %v1344_v21 }
  0x1e   :  { %75 = vadd.xlane.f32.xlu1 %v1339_v20  ;;  %73 = vadd.xlane.f32.xlu0 %v1344_v21 }
  0x1f   :  { %v123_v44 = vadd.f32 %v122_v43, %v1339_v20 }
  0x20   :  { %994 = vmatpush3.bf16.msra.mxu0 %v1136_v23  ;;  %1022 = vmatpush3.bf16.msra.mxu1 %v1142_v36 }
  0x21   :  { %v124_v45 = vrot.slane %v123_v44, 4 }
  0x23   :  { %v125_v46 = vadd.f32 %v124_v45, %v123_v44 }
  0x25   :  { %v126_v47 = vrot.slane %v125_v46, 2 }
  0x27   :  { %v127_v48 = vadd.f32 %v126_v47, %v125_v46 }
  0x29   :  { %v128_v49 = vrot.slane %v127_v48, 1 }
  0x2b   :  { %v129_v50 = vadd.f32 %v128_v49, %v127_v48 }
  0x2d   :  { %v130_v55 = vmax.f32 %v129_v50, 1e-12 }
  0x8b   :  { %v50_v51 = vpop.xlane.xlu1 %49  ;;  %v46_v52 = vpop.xlane.xlu0 %45 }
  0x8c   :  { %v79_v53 = vmax.f32 %v50_v51, 1e-12  ;;  %v77_v54 = vmax.f32 %v46_v52, 1e-12 }
  0x8e   :  { %1153 = vrsqrt.f32 %v79_v53 }
  0x8f   :  { %1155 = vrsqrt.f32 %v77_v54  ;;  %v52_v56 = vpop.xlane.xlu1 %51  ;;  %v48_v57 = vpop.xlane.xlu0 %47 }
  0x90   :  { %v80_v58 = vmax.f32 %v52_v56, 1e-12  ;;  %v78_v59 = vmax.f32 %v48_v57, 1e-12  ;;  %1157 = vrsqrt.f32 %v130_v55 }
  0x92   :  { %1159 = vrsqrt.f32 %v80_v58 }
  0x93   :  { %1161 = vrsqrt.f32 %v78_v59  ;;  %v56_v60 = vpop.xlane.xlu1 %55  ;;  %v54_v61 = vpop.xlane.xlu0 %53 }
  0x94   :  { %v82_v62 = vmax.f32 %v56_v60, 1e-12  ;;  %v81_v63 = vmax.f32 %v54_v61, 1e-12 }
  0x96   :  { %1163 = vrsqrt.f32 %v82_v62 }
  0x97   :  { %1165 = vrsqrt.f32 %v81_v63  ;;  %v60_v6 = vpop.xlane.xlu1 %59  ;;  %v58_v7 = vpop.xlane.xlu0 %57 }
  0x98   :  { %v84_v10 = vmax.f32 %v60_v6, 1e-12  ;;  %v83_v13 = vmax.f32 %v58_v7, 1e-12 }
  0x9a   :  { %1167 = vrsqrt.f32 %v84_v10 }
  0x9b   :  { %v1154_v16 = vpop.eup %1153  ;;  %1169 = vrsqrt.f32 %v83_v13  ;;  %v64_v19 = vpop.xlane.xlu1 %63 }
  0x9c   :  { %v62_v22 = vpop.xlane.xlu0 %61  ;;  %v1156_v23 = vpop.eup %1155  ;;  %v86_v24 = vmax.f32 %v64_v19, 1e-12  ;;  %v134_v27 = vmul.f32 %v1154_v16, %v1237_v0 }
  0x9d   :  { %v85_v25 = vmax.f32 %v62_v22, 1e-12  ;;  %v1388_v26 = vpop.eup %1157  ;;  %v132_v31 = vmul.f32 %v1156_v23, %v1242_v1 }
  0x9e   :  { %1171 = vrsqrt.f32 %v86_v24  ;;  %v150_v37 = vmul.f32 %v1388_v26, %v134_v27 }
  0x9f   :  { %v1160_v28 = vpop.eup %1159  ;;  %1173 = vrsqrt.f32 %v85_v25  ;;  %v68_v29 = vpop.xlane.xlu1 %67  ;;  %v148_v41 = vmul.f32 %v1388_v26, %v132_v31 }
  0xa0   :  { %v66_v30 = vpop.xlane.xlu0 %65  ;;  %v1162_v32 = vpop.eup %1161  ;;  %v88_v33 = vmax.f32 %v68_v29, 1e-12  ;;  %v135_v35 = vmul.f32 %v1160_v28, %v1249_v2 }
  0xa1   :  { %v87_v34 = vmax.f32 %v66_v30, 1e-12  ;;  %v133_v36 = vmul.f32 %v1162_v32, %v1254_v3  ;;  %v1143_v32 = vld [vmem:[%s1559_s2 + $0x8] sm:$0xff]  }
  0xa2   :  { %1175 = vrsqrt.f32 %v88_v33  ;;  %v151_v38 = vmul.f32 %v1388_v26, %v135_v35  ;;  %1023 = vmatprep.subr.bf16.mxu1 %v1143_v32 }
  0xa3   :  { %v1164_v39 = vpop.eup %1163  ;;  %1177 = vrsqrt.f32 %v87_v34  ;;  %v72_v0 = vpop.xlane.xlu1 %71  ;;  %v149_v1 = vmul.f32 %v1388_v26, %v133_v36  ;;  %1024 = vmatpush3.bf16.msra.mxu1 %v1143_v32 }
  0xa4   :  { %v70_v40 = vpop.xlane.xlu0 %69  ;;  %v1166_v42 = vpop.eup %1165  ;;  %v90_v43 = vmax.f32 %v72_v0, 1e-12  ;;  %v1398_v45 = vpack.c.bf16 %v151_v38, %v150_v37  ;;  %v137_v2 = vmul.f32 %v1164_v39, %v1259_v4 }
  0xa5   :  { %v89_v44 = vmax.f32 %v70_v40, 1e-12  ;;  %v164_v3 = vpack.c.bf16 %v149_v1, %v148_v41  ;;  %v136_v46 = vmul.f32 %v1166_v42, %v1266_v5 }
  0xa6   :  { %1179 = vrsqrt.f32 %v90_v43  ;;  %v153_v47 = vmul.f32 %v1388_v26, %v137_v2 }
  0xa7   :  { %v1168_v48 = vpop.eup %1167  ;;  %1181 = vrsqrt.f32 %v89_v44  ;;  %995 = vmatprep.mubr.bf16.mxu0 %v164_v3  ;;  %v76_v49 = vpop.xlane.xlu1 %75  ;;  %v152_v51 = vmul.f32 %v1388_v26, %v136_v46 }
  0xa8   :  { %v74_v50 = vpop.xlane.xlu0 %73  ;;  %v1170_v52 = vpop.eup %1169  ;;  %996 = vmatmul.mubr.bf16.vlgmr.msra.gmra.mxu0 %v1398_v45  ;;  %v92_v53 = vmax.f32 %v76_v49, 1e-12  ;;  %v139_v4 = vmul.f32 %v1168_v48, %v1277_v8 }
  0xa9   :  { %v91_v54 = vmax.f32 %v74_v50, 1e-12  ;;  %v1406_v55 = vpack.c.bf16 %v153_v47, %v152_v51  ;;  %v138_v5 = vmul.f32 %v1170_v52, %v1282_v9  ;;  %v1145_v52 = vld [vmem:[%s1560_s4 + $0x38] sm:$0xff]  }
  0xaa   :  { %1183 = vrsqrt.f32 %v92_v53  ;;  %v155_v56 = vmul.f32 %v1388_v26, %v139_v4  ;;  %v1146_v53 = vld [vmem:[%s1560_s4 + $0x30] sm:$0xff]   ;;  %v1148_v4 = vld [vmem:[%s1560_s4 + $0x20] sm:$0xff]  }
  0xab   :  { %v1172_v57 = vpop.eup %1171  ;;  %1185 = vrsqrt.f32 %v91_v54  ;;  %999 = vmatprep.mubr.bf16.mxu0 %v1406_v55  ;;  %v154_v58 = vmul.f32 %v1388_v26, %v138_v5  ;;  %v1147_v54 = vld [vmem:[%s1560_s4 + $0x28] sm:$0xff]   ;;  %v1149_v5 = vld [vmem:[%s1560_s4 + $0x18] sm:$0xff]  }
  0xac   :  { %v1174_v59 = vpop.eup %1173  ;;  %v141_v60 = vmul.f32 %v1172_v57, %v1294_v11 }
  0xad   :  { %v1413_v61 = vpack.c.bf16 %v155_v56, %v154_v58  ;;  %v140_v8 = vmul.f32 %v1174_v59, %v1299_v12  ;;  %v1150_v56 = vld [vmem:[%s1560_s4 + $0x10] sm:$0xff]  }
  0xae   :  { %v157_v62 = vmul.f32 %v1388_v26, %v141_v60 }
  0xaf   :  { %v1176_v63 = vpop.eup %1175  ;;  %v156_v9 = vmul.f32 %v1388_v26, %v140_v8 }
  0xb0   :  { %v1178_v6 = vpop.eup %1177  ;;  %1000 = vmatmul.mubr.bf16.gmra.mxu0 %v1413_v61  ;;  %v143_v7 = vmul.f32 %v1176_v63, %v1309_v14 }
  0xb1   :  { %v1420_v10 = vpack.c.bf16 %v157_v62, %v156_v9  ;;  %v142_v13 = vmul.f32 %v1178_v6, %v1314_v15 }
  0xb2   :  { %v159_v11 = vmul.f32 %v1388_v26, %v143_v7 }
  0xb3   :  { %v1180_v16 = vpop.eup %1179  ;;  %1003 = vmatprep.mubr.bf16.mxu0 %v1420_v10  ;;  %v158_v12 = vmul.f32 %v1388_v26, %v142_v13 }
  0xb4   :  { %v1182_v19 = vpop.eup %1181  ;;  %v145_v22 = vmul.f32 %v1180_v16, %v1324_v17 }
  0xb5   :  { %v1427_v23 = vpack.c.bf16 %v159_v11, %v158_v12  ;;  %v144_v24 = vmul.f32 %v1182_v19, %v1329_v18  ;;  %v888_v12 = vld [vmem:[%s1561_s3] ss:$0 sm:$0xff] }
  0xb6   :  { %v161_v14 = vmul.f32 %v1388_v26, %v145_v22 }
  0xb7   :  { %v1184_v25 = vpop.eup %1183  ;;  %v160_v27 = vmul.f32 %v1388_v26, %v144_v24 }
  0xb8   :  { %v1186_v15 = vpop.eup %1185  ;;  %1004 = vmatmul.mubr.bf16.gmra.mxu0 %v1427_v23  ;;  %v147_v28 = vmul.f32 %v1184_v25, %v1339_v20  ;;  %v1144_v20 = vld [vmem:[%s1559_s2] sm:$0xff]  }
  0xb9   :  { %v1434_v29 = vpack.c.bf16 %v161_v14, %v160_v27  ;;  %v146_v30 = vmul.f32 %v1186_v15, %v1344_v21  ;;  %1025 = vmatprep.subr.bf16.mxu1 %v1144_v20 }
  0xba   :  { %v163_v17 = vmul.f32 %v1388_v26, %v147_v28  ;;  %1026 = vmatpush3.bf16.msra.mxu1 %v1144_v20 }
  0xbb   :  { %1007 = vmatprep.mubr.bf16.mxu0 %v1434_v29  ;;  %v162_v18 = vmul.f32 %v1388_v26, %v146_v30  ;;  %1075 = vmatprep.subr.bf16.mxu1 %v1145_v52 }
  0xbd   :  { %v1440_v31 = vpack.c.bf16 %v163_v17, %v162_v18 }
  0xc0   :  { %1008 = vmatmul.mubr.bf16.gmra.mxu0 %v1440_v31 }
  0xc1   :  { %1059 = vmatprep.mubr.bf16.mxu0 %v164_v3 }
 0x168   :  { %v997_v21 = vpop.f32.mrf.mxu0 }
 0x16a   :  { %v270_v33 = vpop.f32.mrf.mxu0 }
 0x16c   :  { %v998_v26 = vpop.f32.mrf.mxu0 }
 0x16d   :  { %v334_v36 = vpack.c.bf16 %v998_v26, %v997_v21 }
 0x16e   :  { %v273_v34 = vpop.f32.mrf.mxu0 }
 0x16f   :  { %v333_v35 = vpack.c.bf16 %v273_v34, %v270_v33 }
 0x170   :  { %v1001_v37 = vpop.f32.mrf.mxu0 }
 0x171   :  { %1027 = vmatprep.mubr.bf16.mxu1 %v333_v35 }
 0x172   :  { %v286_v38 = vpop.f32.mrf.mxu0  ;;  %1028 = vmatmul.mubr.bf16.vlgmr.msra.gmra.mxu1 %v334_v36 }
 0x173   :  { %1076 = vmatpush3.bf16.msra.mxu1 %v1145_v52 }
 0x174   :  { %v1002_v39 = vpop.f32.mrf.mxu0  ;;  %1077 = vmatprep.subr.bf16.mxu1 %v1146_v53 }
 0x175   :  { %v336_v41 = vpack.c.bf16 %v1002_v39, %v1001_v37 }
 0x176   :  { %v289_v0 = vpop.f32.mrf.mxu0 }
 0x177   :  { %v335_v40 = vpack.c.bf16 %v289_v0, %v286_v38  ;;  %1078 = vmatpush3.bf16.msra.mxu1 %v1146_v53 }
 0x178   :  { %v1005_v1 = vpop.f32.mrf.mxu0  ;;  %1079 = vmatprep.subr.bf16.mxu1 %v1147_v54 }
 0x179   :  { %1031 = vmatprep.mubr.bf16.mxu1 %v335_v40 }
 0x17a   :  { %v302_v42 = vpop.f32.mrf.mxu0  ;;  %1032 = vmatmul.mubr.bf16.gmra.mxu1 %v336_v41 }
 0x17b   :  { %1080 = vmatpush3.bf16.msra.mxu1 %v1147_v54 }
 0x17c   :  { %v1006_v43 = vpop.f32.mrf.mxu0  ;;  %1081 = vmatprep.subr.bf16.mxu1 %v1148_v4 }
 0x17d   :  { %v338_v3 = vpack.c.bf16 %v1006_v43, %v1005_v1 }
 0x17e   :  { %v305_v44 = vpop.f32.mrf.mxu0 }
 0x17f   :  { %v337_v2 = vpack.c.bf16 %v305_v44, %v302_v42  ;;  %1082 = vmatpush3.bf16.msra.mxu1 %v1148_v4 }
 0x180   :  { %v1009_v46 = vpop.f32.mrf.mxu0  ;;  %1083 = vmatprep.subr.bf16.mxu1 %v1149_v5 }
 0x181   :  { %1035 = vmatprep.mubr.bf16.mxu1 %v337_v2 }
 0x182   :  { %v318_v47 = vpop.f32.mrf.mxu0  ;;  %1036 = vmatmul.mubr.bf16.gmra.mxu1 %v338_v3 }
 0x183   :  { %1084 = vmatpush3.bf16.msra.mxu1 %v1149_v5 }
 0x184   :  { %v1010_v48 = vpop.f32.mrf.mxu0  ;;  %1085 = vmatprep.subr.bf16.mxu1 %v1150_v56 }
 0x185   :  { %v340_v51 = vpack.c.bf16 %v1010_v48, %v1009_v46 }
 0x186   :  { %v321_v49 = vpop.f32.mrf.mxu0 }
 0x187   :  { %v339_v50 = vpack.c.bf16 %v321_v49, %v318_v47  ;;  %1086 = vmatpush3.bf16.msra.mxu1 %v1150_v56 }
 0x189   :  { %1039 = vmatprep.mubr.bf16.mxu1 %v339_v50 }
 0x18a   :  { %1040 = vmatmul.mubr.bf16.gmra.mxu1 %v340_v51 }
 0x232   :  { %v1029_v57 = vpop.f32.mrf.mxu1 }
 0x233   :  { %v455_v47 = vadd.f32 %v1029_v57, %v888_v12  ;;  %v1151_v57 = vld [vmem:[%s1560_s4 + $0x8] sm:$0xff]  }
 0x234   :  { %v446_v58 = vpop.f32.mrf.mxu1  ;;  %1087 = vmatprep.subr.bf16.mxu1 %v1151_v57 }
 0x235   :  { %v511_v52 = vmax.f32 %v455_v47, 0.0  ;;  %v447_v53 = vadd.f32 %v888_v12, %v446_v58  ;;  %1088 = vmatpush3.bf16.msra.mxu1 %v1151_v57 }
 0x236   :  { %v1030_v59 = vpop.f32.mrf.mxu1 }
 0x237   :  { %v458_v2 = vadd.f32 %v1030_v59, %v888_v12  ;;  %v509_v5 = vmax.f32 %v447_v53, 0.0 }
 0x238   :  { %v449_v60 = vpop.f32.mrf.mxu1 }
 0x239   :  { %v512_v49 = vmax.f32 %v458_v2, 0.0  ;;  %v450_v50 = vadd.f32 %v888_v12, %v449_v60 }
 0x23a   :  { %v1033_v8 = vpop.f32.mrf.mxu1 }
 0x23b   :  { %v471_v0 = vadd.f32 %v1033_v8, %v888_v12  ;;  %v526_v54 = vpack.c.bf16 %v512_v49, %v511_v52  ;;  %v510_v4 = vmax.f32 %v450_v50, 0.0 }
 0x23c   :  { %v462_v62 = vpop.f32.mrf.mxu1 }
 0x23d   :  { %v515_v43 = vmax.f32 %v471_v0, 0.0  ;;  %v463_v44 = vadd.f32 %v888_v12, %v462_v62  ;;  %v525_v56 = vpack.c.bf16 %v510_v4, %v509_v5 }
 0x23e   :  { %v1034_v63 = vpop.f32.mrf.mxu1 }
 0x23f   :  { %v474_v37 = vadd.f32 %v1034_v63, %v888_v12  ;;  %v513_v48 = vmax.f32 %v463_v44, 0.0 }
 0x240   :  { %v465_v9 = vpop.f32.mrf.mxu1 }
 0x241   :  { %v516_v41 = vmax.f32 %v474_v37, 0.0  ;;  %v466_v1 = vadd.f32 %v888_v12, %v465_v9 }
 0x242   :  { %v1037_v6 = vpop.f32.mrf.mxu1 }
 0x243   :  { %v487_v18 = vadd.f32 %v1037_v6, %v888_v12  ;;  %v528_v3 = vpack.c.bf16 %v516_v41, %v515_v43  ;;  %v514_v46 = vmax.f32 %v466_v1, 0.0 }
 0x244   :  { %v478_v7 = vpop.f32.mrf.mxu1 }
 0x245   :  { %v519_v35 = vmax.f32 %v487_v18, 0.0  ;;  %v479_v36 = vadd.f32 %v888_v12, %v478_v7  ;;  %v527_v51 = vpack.c.bf16 %v514_v46, %v513_v48 }
 0x246   :  { %v1038_v13 = vpop.f32.mrf.mxu1 }
 0x247   :  { %v490_v15 = vadd.f32 %v1038_v13, %v888_v12  ;;  %v517_v40 = vmax.f32 %v479_v36, 0.0 }
 0x248   :  { %v481_v11 = vpop.f32.mrf.mxu1 }
 0x249   :  { %v520_v33 = vmax.f32 %v490_v15, 0.0  ;;  %v482_v26 = vadd.f32 %v888_v12, %v481_v11  ;;  %v897_v15 = vld [vmem:[%s1562_s5] ss:$0 sm:$0xff] }
 0x24a   :  { %v1041_v16 = vpop.f32.mrf.mxu1 }
 0x24b   :  { %v503_v22 = vadd.f32 %v1041_v16, %v888_v12  ;;  %v530_v38 = vpack.c.bf16 %v520_v33, %v519_v35  ;;  %v518_v39 = vmax.f32 %v482_v26, 0.0 }
 0x24c   :  { %v494_v19 = vpop.f32.mrf.mxu1 }
 0x24d   :  { %v495_v14 = vadd.f32 %v888_v12, %v494_v19  ;;  %v523_v28 = vmax.f32 %v503_v22, 0.0  ;;  %v529_v42 = vpack.c.bf16 %v518_v39, %v517_v40 }
 0x24e   :  { %v1042_v24 = vpop.f32.mrf.mxu1 }
 0x24f   :  { %v506_v25 = vadd.f32 %v1042_v24, %v888_v12  ;;  %v521_v32 = vmax.f32 %v495_v14, 0.0 }
 0x250   :  { %v497_v27 = vpop.f32.mrf.mxu1 }
 0x251   :  { %v524_v30 = vmax.f32 %v506_v25, 0.0  ;;  %v498_v17 = vadd.f32 %v888_v12, %v497_v27  ;;  %v1187_v27 = vmov 0.0  }
 0x253   :  { %v532_v20 = vpack.c.bf16 %v524_v30, %v523_v28  ;;  %v522_v21 = vmax.f32 %v498_v17, 0.0 }
 0x255   :  { %v531_v34 = vpack.c.bf16 %v522_v21, %v521_v32  ;;  %1043 = vmatprep.subr.bf16.mxu0 %v532_v20 }
 0x256   :  { %1044 = vmatpush3.bf16.msra.mxu0 %v532_v20 }
 0x257   :  { %1045 = vmatprep.subr.bf16.mxu0 %v531_v34 }
 0x25a   :  { %1046 = vmatpush3.bf16.msra.mxu0 %v531_v34 }
 0x25b   :  { %1047 = vmatprep.subr.bf16.mxu0 %v530_v38 }
 0x25e   :  { %1048 = vmatpush3.bf16.msra.mxu0 %v530_v38 }
 0x25f   :  { %1049 = vmatprep.subr.bf16.mxu0 %v529_v42 }
 0x262   :  { %1050 = vmatpush3.bf16.msra.mxu0 %v529_v42 }
 0x263   :  { %1051 = vmatprep.subr.bf16.mxu0 %v528_v3 }
 0x266   :  { %1052 = vmatpush3.bf16.msra.mxu0 %v528_v3 }
 0x267   :  { %1053 = vmatprep.subr.bf16.mxu0 %v527_v51 }
 0x26a   :  { %1054 = vmatpush3.bf16.msra.mxu0 %v527_v51 }
 0x26b   :  { %1055 = vmatprep.subr.bf16.mxu0 %v526_v54 }
 0x26e   :  { %1056 = vmatpush3.bf16.msra.mxu0 %v526_v54 }
 0x26f   :  { %1057 = vmatprep.subr.bf16.mxu0 %v525_v56 }
 0x272   :  { %1058 = vmatpush3.bf16.msra.mxu0 %v525_v56 }
 0x273   :  { %1107 = vmatprep.subr.bf16.mxu0 %v1187_v27 }
 0x275   :  { %1060 = vmatmul.mubr.bf16.vlgmr.msra.gmra.mxu0 %v1398_v45  ;;  %v1152_v45 = vld [vmem:[%s1560_s4] sm:$0xff]  }
 0x276   :  { %1063 = vmatprep.mubr.bf16.mxu0 %v1406_v55  ;;  %1089 = vmatprep.subr.bf16.mxu1 %v1152_v45 }
 0x277   :  { %1090 = vmatpush3.bf16.msra.mxu1 %v1152_v45 }
 0x27d   :  { %1064 = vmatmul.mubr.bf16.gmra.mxu0 %v1413_v61 }
 0x27e   :  { %1067 = vmatprep.mubr.bf16.mxu0 %v1420_v10 }
 0x285   :  { %1068 = vmatmul.mubr.bf16.gmra.mxu0 %v1427_v23 }
 0x286   :  { %1071 = vmatprep.mubr.bf16.mxu0 %v1434_v29 }
 0x28d   :  { %1072 = vmatmul.mubr.bf16.gmra.mxu0 %v1440_v31 }
 0x28e   :  { %1123 = vmatprep.mubr.msk.bf16.mxu0 %vm1188_vm0, %v1187_v27 }
 0x335   :  { %v1061_v55 = vpop.f32.mrf.mxu0 }
 0x337   :  { %v567_v61 = vpop.f32.mrf.mxu0 }
 0x339   :  { %v1062_v10 = vpop.f32.mrf.mxu0 }
 0x33a   :  { %v631_v29 = vpack.c.bf16 %v1062_v10, %v1061_v55  ;;  %v822_v10 = vld [vmem:[%s1564_s6] sm:$0xf] }
 0x33b   :  { %v570_v23 = vpop.f32.mrf.mxu0 }
 0x33c   :  { %v630_v58 = vpack.c.bf16 %v570_v23, %v567_v61 }
 0x33d   :  { %v1065_v59 = vpop.f32.mrf.mxu0 }
 0x33e   :  { %1091 = vmatprep.mubr.bf16.mxu1 %v630_v58 }
 0x33f   :  { %v583_v31 = vpop.f32.mrf.mxu0  ;;  %1092 = vmatmul.mubr.bf16.vlgmr.msra.gmra.mxu1 %v631_v29 }
 0x341   :  { %v1066_v60 = vpop.f32.mrf.mxu0 }
 0x342   :  { %v633_v63 = vpack.c.bf16 %v1066_v60, %v1065_v59 }
 0x343   :  { %v586_v8 = vpop.f32.mrf.mxu0 }
 0x344   :  { %v632_v62 = vpack.c.bf16 %v586_v8, %v583_v31 }
 0x345   :  { %v1069_v9 = vpop.f32.mrf.mxu0 }
 0x346   :  { %1095 = vmatprep.mubr.bf16.mxu1 %v632_v62 }
 0x347   :  { %v599_v6 = vpop.f32.mrf.mxu0  ;;  %1096 = vmatmul.mubr.bf16.gmra.mxu1 %v633_v63 }
 0x349   :  { %v1070_v7 = vpop.f32.mrf.mxu0 }
 0x34a   :  { %v635_v16 = vpack.c.bf16 %v1070_v7, %v1069_v9 }
 0x34b   :  { %v602_v13 = vpop.f32.mrf.mxu0 }
 0x34c   :  { %v634_v11 = vpack.c.bf16 %v602_v13, %v599_v6 }
 0x34d   :  { %v1073_v12 = vpop.f32.mrf.mxu0 }
 0x34e   :  { %1099 = vmatprep.mubr.bf16.mxu1 %v634_v11 }
 0x34f   :  { %v615_v19 = vpop.f32.mrf.mxu0  ;;  %1100 = vmatmul.mubr.bf16.gmra.mxu1 %v635_v16 }
 0x351   :  { %v1074_v22 = vpop.f32.mrf.mxu0 }
 0x352   :  { %v637_v25 = vpack.c.bf16 %v1074_v22, %v1073_v12 }
 0x353   :  { %v618_v24 = vpop.f32.mrf.mxu0 }
 0x354   :  { %v636_v14 = vpack.c.bf16 %v618_v24, %v615_v19 }
 0x356   :  { %1103 = vmatprep.mubr.bf16.mxu1 %v636_v14 }
 0x357   :  { %1104 = vmatmul.mubr.bf16.gmra.mxu1 %v637_v25 }
 0x3ff   :  { %v1093_v28 = vpop.f32.mrf.mxu1 }
 0x400   :  { %v1488_v30 = vadd.f32 %v1093_v28, %v897_v15 }
 0x401   :  { %v743_v17 = vpop.f32.mrf.mxu1 }
 0x402   :  { %808 = vst [vmem:[%s1563_s7 + $0x10] sm:$0xff] %v1488_v30  ;;  %v1494_v18 = vadd.f32 %v897_v15, %v743_v17 }
 0x403   :  { %v1094_v32 = vpop.f32.mrf.mxu1 }
 0x404   :  { %806 = vst [vmem:[%s1563_s7] sm:$0xff] %v1494_v18  ;;  %v755_v20 = vadd.f32 %v1094_v32, %v897_v15 }
 0x405   :  { %v746_v21 = vpop.f32.mrf.mxu1 }
 0x406   :  { %809 = vst [vmem:[%s1563_s7 + $0x18] sm:$0xff] %v755_v20  ;;  %v747_v33 = vadd.f32 %v897_v15, %v746_v21  ;;  %v824_v55 = vpack.c.bf16 %v755_v20, %v1488_v30 }
 0x407   :  { %v1097_v26 = vpop.f32.mrf.mxu1 }
 0x408   :  { %807 = vst [vmem:[%s1563_s7 + $0x8] sm:$0xff] %v747_v33  ;;  %v768_v34 = vadd.f32 %v1097_v26, %v897_v15  ;;  %v823_v61 = vpack.c.bf16 %v747_v33, %v1494_v18 }
 0x409   :  { %v759_v35 = vpop.f32.mrf.mxu1 }
 0x40a   :  { %812 = vst [vmem:[%s1563_s7 + $0x30] sm:$0xff] %v768_v34  ;;  %v760_v36 = vadd.f32 %v897_v15, %v759_v35 }
 0x40b   :  { %v1098_v37 = vpop.f32.mrf.mxu1 }
 0x40c   :  { %810 = vst [vmem:[%s1563_s7 + $0x20] sm:$0xff] %v760_v36  ;;  %v771_v38 = vadd.f32 %v1098_v37, %v897_v15 }
 0x40d   :  { %v762_v39 = vpop.f32.mrf.mxu1 }
 0x40e   :  { %813 = vst [vmem:[%s1563_s7 + $0x38] sm:$0xff] %v771_v38  ;;  %v763_v0 = vadd.f32 %v897_v15, %v762_v39  ;;  %v826_v57 = vpack.c.bf16 %v771_v38, %v768_v34 }
 0x40f   :  { %v1101_v40 = vpop.f32.mrf.mxu1 }
 0x410   :  { %811 = vst [vmem:[%s1563_s7 + $0x28] sm:$0xff] %v763_v0  ;;  %v784_v41 = vadd.f32 %v1101_v40, %v897_v15  ;;  %v825_v45 = vpack.c.bf16 %v763_v0, %v760_v36 }
 0x411   :  { %v775_v1 = vpop.f32.mrf.mxu1 }
 0x412   :  { %816 = vst [vmem:[%s1563_s7 + $0x50] sm:$0xff] %v784_v41  ;;  %v776_v42 = vadd.f32 %v897_v15, %v775_v1 }
 0x413   :  { %v1102_v43 = vpop.f32.mrf.mxu1 }
 0x414   :  { %814 = vst [vmem:[%s1563_s7 + $0x40] sm:$0xff] %v776_v42  ;;  %v787_v44 = vadd.f32 %v1102_v43, %v897_v15 }
 0x415   :  { %v778_v2 = vpop.f32.mrf.mxu1 }
 0x416   :  { %817 = vst [vmem:[%s1563_s7 + $0x58] sm:$0xff] %v787_v44  ;;  %v779_v3 = vadd.f32 %v897_v15, %v778_v2  ;;  %v828_v5 = vpack.c.bf16 %v787_v44, %v784_v41 }
 0x417   :  { %v1105_v46 = vpop.f32.mrf.mxu1 }
 0x418   :  { %815 = vst [vmem:[%s1563_s7 + $0x48] sm:$0xff] %v779_v3  ;;  %v800_v47 = vadd.f32 %v1105_v46, %v897_v15  ;;  %v827_v56 = vpack.c.bf16 %v779_v3, %v776_v42 }
 0x419   :  { %v791_v48 = vpop.f32.mrf.mxu1 }
 0x41a   :  { %820 = vst [vmem:[%s1563_s7 + $0x70] sm:$0xff] %v800_v47  ;;  %v792_v49 = vadd.f32 %v897_v15, %v791_v48 }
 0x41b   :  { %v1106_v50 = vpop.f32.mrf.mxu1 }
 0x41c   :  { %818 = vst [vmem:[%s1563_s7 + $0x60] sm:$0xff] %v792_v49  ;;  %v803_v51 = vadd.f32 %v1106_v50, %v897_v15 }
 0x41d   :  { %v794_v52 = vpop.f32.mrf.mxu1 }
 0x41e   :  { %821 = vst [vmem:[%s1563_s7 + $0x78] sm:$0xff] %v803_v51  ;;  %v830_v53 = vpack.c.bf16 %v803_v51, %v800_v47  ;;  %v795_v54 = vadd.f32 %v897_v15, %v794_v52 }
 0x420   :  { %819 = vst [vmem:[%s1563_s7 + $0x68] sm:$0xff] %v795_v54  ;;  %1108 = vmatpush3.bf16.msra.mxu0 %v830_v53  ;;  %v829_v4 = vpack.c.bf16 %v795_v54, %v792_v49 }
 0x421   :  { %1109 = vmatprep.subr.bf16.mxu0 %v1187_v27 }
 0x424   :  { %1110 = vmatpush3.bf16.msra.mxu0 %v829_v4 }
 0x425   :  { %1111 = vmatprep.subr.bf16.mxu0 %v1187_v27 }
 0x428   :  { %1112 = vmatpush3.bf16.msra.mxu0 %v828_v5 }
 0x429   :  { %1113 = vmatprep.subr.bf16.mxu0 %v1187_v27 }
 0x42c   :  { %1114 = vmatpush3.bf16.msra.mxu0 %v827_v56 }
 0x42d   :  { %1115 = vmatprep.subr.bf16.mxu0 %v1187_v27 }
 0x430   :  { %1116 = vmatpush3.bf16.msra.mxu0 %v826_v57 }
 0x431   :  { %1117 = vmatprep.subr.bf16.mxu0 %v1187_v27 }
 0x434   :  { %1118 = vmatpush3.bf16.msra.mxu0 %v825_v45 }
 0x435   :  { %1119 = vmatprep.subr.bf16.mxu0 %v1187_v27 }
 0x438   :  { %1120 = vmatpush3.bf16.msra.mxu0 %v824_v55 }
 0x439   :  { %1121 = vmatprep.subr.bf16.mxu0 %v1187_v27 }
 0x43c   :  { %1122 = vmatpush3.bf16.msra.mxu0 %v823_v61 }
 0x43f   :  { %1124 = vmatmul.mubr.bf16.vlgmr.msra.gmra.mxu0 %v822_v10 }
 0x4ff   :  { %v865_v23 = vpop.f32.mrf.mxu0 }
 0x500   :  { %871 = vst [vmem:[%s1565_s8] sm:$0xff] %v865_v23 }
 0x501   :  { %v1125_v58 = vpop.f32.mrf.mxu0 }
 0x503   :  { %v868_v29 = vpop.f32.mrf.mxu0 }
 0x505   :  { %v1126_v59 = vpop.f32.mrf.mxu0 }

</bundles_post_ra>
